<compile_context>
chip_gen: v6e
topology: v6e:2x2x1
jax: 0.10.0
libtpu: 0.0.40
codegen_flags: <defaults>
</compile_context>

<pallas_src>
import functools

import jax
import jax.numpy as jnp
from jax.experimental import pallas as pl
from jax.experimental.pallas import tpu as pltpu


def _choose_batch_fold(B, L):
    """Pick Bt = batches folded per grid step.

    Target ~512 M-rows per matmul (fills the MXU M dimension and amortizes the
    ~0.35 us per-grid-step overhead) while keeping >= 2 grid steps when
    possible so both v7x TensorCores stay busy.
    """
    bt_target = max(1, 512 // max(L, 1))
    best = 1
    for cand in range(1, B + 1):
        if B % cand != 0:
            continue
        if cand > bt_target:
            continue
        if B // cand < min(2, B):   # keep >= 2 grid steps when B allows it
            continue
        best = cand
    return best


@functools.partial(jax.jit, static_argnames=("eps",))
def conv_layer_forward(x, weight, bias, gamma, beta, eps=1e-5):
    """x: (B, L, C). weight: (C_out, C_in, 3) (PyTorch Conv1d layout).

    `bias` is accepted for API parity but intentionally not applied: the
    train-mode BatchNorm immediately subtracts the per-channel batch mean,
    which cancels a per-channel conv bias exactly.  (If this layer were ever
    run with running stats / eval mode, the bias would have to be re-added.)
    """
    del bias  # algebraically cancelled by BatchNorm (train mode)
    B, L, C = x.shape

    Bt = _choose_batch_fold(B, L)   # batches per grid step
    G = B // Bt                     # grid steps
    n_inv = 1.0 / float(B * L)      # 1 / (#samples per channel)

    # Stacked tap weights: w2[ci, k*C + co] = weight[co, ci, k].
    # Column block k (lane offset k*C) is tap k; bf16 for the MXU.
    w_stacked = (jnp.transpose(weight, (1, 2, 0))
                 .reshape(C, 3 * C)
                 .astype(jnp.bfloat16))

    gamma2 = gamma.reshape(1, C).astype(jnp.float32)
    beta2 = beta.reshape(1, C).astype(jnp.float32)

    # ------------------------------------------------------------------
    # Shared helper: circular conv1d (k=3, pad=1) on one (Bt, L, C) block.
    #   y[b, l, co] = sum_ci ( w[co,ci,0]*x[b,(l-1)%L,ci]
    #                        + w[co,ci,1]*x[b, l     ,ci]
    #                        + w[co,ci,2]*x[b,(l+1)%L,ci] )
    # ONE bf16 MXU dot on the flattened (Bt*L, C) block against (C, 3C);
    # the circular shift is applied to the RESULT slices via XLU rolls,
    # per batch so the wrap never crosses a sequence boundary.
    # ------------------------------------------------------------------
    def conv_group(x_blk, w_ref):
        xm = x_blk.reshape(Bt * L, C).astype(jnp.bfloat16)
        z = jnp.dot(xm, w_ref[...], preferred_element_type=jnp.float32)
        z = z.reshape(Bt, L, 3 * C)
        ys = []
        for b in range(Bt):                      # static unroll, Bt is small
            zb = z[b]                            # (L, 3C), static slice
            z_m = zb[:, 0:C]                     # tap l-1  (lane offset 0)
            z_c = zb[:, C:2 * C]                 # tap l    (lane offset C)
            z_p = zb[:, 2 * C:3 * C]             # tap l+1  (lane offset 2C)
            # roll(z, +1)[l] = z[(l-1)%L] ; roll(z, L-1)[l] = z[(l+1)%L]
            ys.append(pltpu.roll(z_m, shift=1, axis=0)
                      + z_c
                      + pltpu.roll(z_p, shift=L - 1, axis=0))
        return ys                                # list of Bt (L, C) f32 tiles

    # ---------------- pass 1: partial BN statistics ----------------
    def stats_kernel(x_ref, w_ref, sum_ref, sq_ref):
        ys = conv_group(x_ref[...], w_ref)
        s = jnp.zeros((1, C), jnp.float32)
        q = jnp.zeros((1, C), jnp.float32)
        for y in ys:
            s = s + jnp.sum(y, axis=0, keepdims=True)
            q = q + jnp.sum(y * y, axis=0, keepdims=True)
        sum_ref[0] = s
        sq_ref[0] = q

    # ------- pass 2: recompute conv, in-kernel BN finalize + ELU -------
    def apply_kernel(psum_ref, psq_ref, x_ref, w_ref, gamma_ref, beta_ref,
                     o_ref):
        # BN finalize: C-length VPU/EUP work, duplicated per grid step (cheap).
        ch_sum = jnp.sum(psum_ref[...], axis=0)          # (1, C)
        ch_sq = jnp.sum(psq_ref[...], axis=0)            # (1, C)
        mean = ch_sum * n_inv
        var = jnp.maximum(ch_sq * n_inv - mean * mean, 0.0)   # biased var
        inv_std = jax.lax.rsqrt(var + eps)
        scale = gamma_ref[...] * inv_std                 # (1, C)
        shift = beta_ref[...] - mean * scale             # (1, C)

        ys = conv_group(x_ref[...], w_ref)
        for b, y in enumerate(ys):
            z = y * scale + shift
            # ELU(alpha=1): z if z > 0 else exp(z) - 1 (exp on EUP; arg clamped).
            # exp(min(z,0))-1 kept instead of expm1 for Mosaic-lowering safety.
            o_ref[b] = jnp.where(
                z > 0, z, jnp.exp(jnp.minimum(z, 0.0)) - 1.0).astype(o_ref.dtype)

    # --- pass 1 call ---
    part_sum, part_sq = pl.pallas_call(
        stats_kernel,
        out_shape=(
            jax.ShapeDtypeStruct((G, 1, C), jnp.float32),
            jax.ShapeDtypeStruct((G, 1, C), jnp.float32),
        ),
        grid_spec=pltpu.PrefetchScalarGridSpec(
            num_scalar_prefetch=0,
            grid=(G,),
            in_specs=[
                pl.BlockSpec((Bt, L, C), lambda g: (g, 0, 0)),    # x
                pl.BlockSpec((C, 3 * C), lambda g: (0, 0)),       # stacked w
            ],
            out_specs=[
                pl.BlockSpec((1, 1, C), lambda g: (g, 0, 0)),     # partial sum
                pl.BlockSpec((1, 1, C), lambda g: (g, 0, 0)),     # partial sumsq
            ],
        ),
        compiler_params=pltpu.CompilerParams(
            dimension_semantics=("parallel",)),
    )(x, w_stacked)

    # --- pass 2 call ---
    out = pl.pallas_call(
        apply_kernel,
        out_shape=jax.ShapeDtypeStruct((B, L, C), x.dtype),
        grid_spec=pltpu.PrefetchScalarGridSpec(
            num_scalar_prefetch=0,
            grid=(G,),
            in_specs=[
                pl.BlockSpec((G, 1, C), lambda g: (0, 0, 0)),     # partial sum
                pl.BlockSpec((G, 1, C), lambda g: (0, 0, 0)),     # partial sumsq
                pl.BlockSpec((Bt, L, C), lambda g: (g, 0, 0)),    # x
                pl.BlockSpec((C, 3 * C), lambda g: (0, 0)),       # stacked w
                pl.BlockSpec((1, C), lambda g: (0, 0)),           # gamma
                pl.BlockSpec((1, C), lambda g: (0, 0)),           # beta
            ],
            out_specs=pl.BlockSpec((Bt, L, C), lambda g: (g, 0, 0)),
        ),
        compiler_params=pltpu.CompilerParams(
            dimension_semantics=("parallel",)),
    )(part_sum, part_sq, x, w_stacked, gamma2, beta2)

    return out


# ----------------------------------------------------------------------------
# Pure-JAX reference (for the correctness check) — includes the conv bias.
# ----------------------------------------------------------------------------
def reference_forward(x, weight, bias, gamma, beta, eps=1e-5):
    B, L, C = x.shape
    xc = jnp.transpose(x, (0, 2, 1))                      # (B, C, L)
    xc_pad = jnp.concatenate([xc[:, :, -1:], xc, xc[:, :, :1]], axis=2)
    y = jax.lax.conv_general_dilated(
        xc_pad, weight, window_strides=(1,), padding="VALID",
        dimension_numbers=("NCH", "OIH", "NCH"),
        precision=jax.lax.Precision.HIGHEST)
    y = y + bias[None, :, None]                           # (B, C, L)
    mean = jnp.mean(y, axis=(0, 2), keepdims=True)
    var = jnp.mean((y - mean) ** 2, axis=(0, 2), keepdims=True)
    yn = (y - mean) / jnp.sqrt(var + eps)
    yn = yn * gamma[None, :, None] + beta[None, :, None]
    act = jnp.where(yn > 0, yn, jnp.exp(jnp.minimum(yn, 0.0)) - 1.0)
    return jnp.transpose(act, (0, 2, 1))                  # (B, L, C)


if __name__ == "__main__":
    # Small but lane-dense shapes: C = 128 fills the 128-lane vreg axis.
    B, L, C = 4, 16, 128

    key = jax.random.PRNGKey(0)
    kx, kw, kb, kg, kbeta = jax.random.split(key, 5)

    x = jax.random.normal(kx, (B, L, C), dtype=jnp.float32)

    # Conv1d-style init: U(-bound, bound), bound = 1/sqrt(fan_in)
    fan_in = C * 3
    bound = 1.0 / float(jnp.sqrt(fan_in))
    weight = jax.random.uniform(kw, (C, C, 3), jnp.float32, -bound, bound)
    bias = jax.random.uniform(kb, (C,), jnp.float32, -bound, bound)

    # BatchNorm1d affine params (perturbed from defaults to exercise the path)
    gamma = 1.0 + 0.1 * jax.random.normal(kg, (C,), jnp.float32)
    beta = 0.1 * jax.random.normal(kbeta, (C,), jnp.float32)

    out = conv_layer_forward(x, weight, bias, gamma, beta)
    out = jax.block_until_ready(out)

    ref = reference_forward(x, weight, bias, gamma, beta)
    assert out.shape == (B, L, C)
    # Kernel matmuls use bf16 inputs with f32 accumulation (per perf review);
    # reference uses f32 HIGHEST.  Post-BN values are O(1) and the expected
    # bf16-induced deviation is ~1e-2 worst-case, so 3e-2 validates taps /
    # BN / ELU correctness with comfortable margin.
    assert jnp.allclose(out, ref, atol=3e-2, rtol=3e-2), "mismatch vs reference"

    print("KERNEL_OK")
</pallas_src>

<mosaic_0001>
module attributes {stable_mosaic.version = 11 : i64} {
  func.func @stats_kernel(%arg0: i32, %arg1: memref<2x16x128xf32, #tpu.memory_space<vmem>>, %arg2: memref<128x384xbf16, #tpu.memory_space<vmem>>, %arg3: memref<1x1x128xf32, #tpu.memory_space<vmem>>, %arg4: memref<1x1x128xf32, #tpu.memory_space<vmem>>) attributes {dimension_semantics = [#tpu.dimension_semantics<parallel>], iteration_bounds = array<i64: 2>, scalar_prefetch = 0 : i64, scratch_operands = 0 : i64, tpu.core_type = #tpu.core_type<tc>, window_params = [{transform_indices = @transform_0, window_bounds = array<i64: 2, 16, 128>}, {pipeline_mode = #tpu.pipeline_mode<synchronous>, transform_indices = @transform_1, window_bounds = array<i64: 128, 384>}, {transform_indices = @transform_2, window_bounds = array<i64: 1, 1, 128>}, {transform_indices = @transform_3, window_bounds = array<i64: 1, 1, 128>}]} {
    %c0 = arith.constant 0 : index
    %c0_0 = arith.constant 0 : index
    %c0_1 = arith.constant 0 : index
    %0 = vector.load %arg1[%c0, %c0_0, %c0_1] : memref<2x16x128xf32, #tpu.memory_space<vmem>>, vector<2x16x128xf32>
    %1 = vector.shape_cast %0 : vector<2x16x128xf32> to vector<32x128xf32>
    %2 = arith.truncf %1 : vector<32x128xf32> to vector<32x128xbf16>
    %c0_2 = arith.constant 0 : index
    %c0_3 = arith.constant 0 : index
    %3 = vector.load %arg2[%c0_2, %c0_3] : memref<128x384xbf16, #tpu.memory_space<vmem>>, vector<128x384xbf16>
    %cst = arith.constant dense<0.000000e+00> : vector<32x384xf32>
    %4 = tpu.matmul %2, %3, %cst {dimension_numbers = #tpu.dot_dimension_numbers<[1], [0], [0], [1], [0, 0, 1, 1], [], []>} : vector<32x128xbf16>, vector<128x384xbf16>, vector<32x384xf32> -> vector<32x384xf32>
    %5 = vector.shape_cast %4 : vector<32x384xf32> to vector<2x16x384xf32>
    %6 = vector.extract_strided_slice %5 {offsets = [0, 0, 0], sizes = [1, 16, 384], strides = [1, 1, 1]} : vector<2x16x384xf32> to vector<1x16x384xf32>
    %7 = vector.shape_cast %6 : vector<1x16x384xf32> to vector<16x384xf32>
    %8 = vector.extract_strided_slice %7 {offsets = [0, 0], sizes = [16, 128], strides = [1, 1]} : vector<16x384xf32> to vector<16x128xf32>
    %9 = vector.extract_strided_slice %7 {offsets = [0, 128], sizes = [16, 128], strides = [1, 1]} : vector<16x384xf32> to vector<16x128xf32>
    %10 = vector.extract_strided_slice %7 {offsets = [0, 256], sizes = [16, 128], strides = [1, 1]} : vector<16x384xf32> to vector<16x128xf32>
    %c1_i32 = arith.constant 1 : i32
    %11 = tpu.dynamic_rotate %8 by %c1_i32 dim 0 : vector<16x128xf32>, i32 -> vector<16x128xf32>
    %12 = arith.addf %11, %9 : vector<16x128xf32>
    %c15_i32 = arith.constant 15 : i32
    %13 = tpu.dynamic_rotate %10 by %c15_i32 dim 0 : vector<16x128xf32>, i32 -> vector<16x128xf32>
    %14 = arith.addf %12, %13 : vector<16x128xf32>
    %15 = vector.extract_strided_slice %5 {offsets = [1, 0, 0], sizes = [1, 16, 384], strides = [1, 1, 1]} : vector<2x16x384xf32> to vector<1x16x384xf32>
    %16 = vector.shape_cast %15 : vector<1x16x384xf32> to vector<16x384xf32>
    %17 = vector.extract_strided_slice %16 {offsets = [0, 0], sizes = [16, 128], strides = [1, 1]} : vector<16x384xf32> to vector<16x128xf32>
    %18 = vector.extract_strided_slice %16 {offsets = [0, 128], sizes = [16, 128], strides = [1, 1]} : vector<16x384xf32> to vector<16x128xf32>
    %19 = vector.extract_strided_slice %16 {offsets = [0, 256], sizes = [16, 128], strides = [1, 1]} : vector<16x384xf32> to vector<16x128xf32>
    %c1_i32_4 = arith.constant 1 : i32
    %20 = tpu.dynamic_rotate %17 by %c1_i32_4 dim 0 : vector<16x128xf32>, i32 -> vector<16x128xf32>
    %21 = arith.addf %20, %18 : vector<16x128xf32>
    %c15_i32_5 = arith.constant 15 : i32
    %22 = tpu.dynamic_rotate %19 by %c15_i32_5 dim 0 : vector<16x128xf32>, i32 -> vector<16x128xf32>
    %23 = arith.addf %21, %22 : vector<16x128xf32>
    %cst_6 = arith.constant 0.000000e+00 : f32
    %24 = vector.broadcast %cst_6 : f32 to vector<1x128xf32>
    %cst_7 = arith.constant 0.000000e+00 : f32
    %25 = vector.broadcast %cst_7 : f32 to vector<1x128xf32>
    %cst_8 = arith.constant dense<0.000000e+00> : vector<128xf32>
    %26 = vector.multi_reduction <add>, %14, %cst_8 [0] : vector<16x128xf32> to vector<128xf32>
    %27 = vector.shape_cast %26 : vector<128xf32> to vector<1x128xf32>
    %28 = arith.addf %24, %27 : vector<1x128xf32>
    %29 = arith.mulf %14, %14 : vector<16x128xf32>
    %cst_9 = arith.constant dense<0.000000e+00> : vector<128xf32>
    %30 = vector.multi_reduction <add>, %29, %cst_9 [0] : vector<16x128xf32> to vector<128xf32>
    %31 = vector.shape_cast %30 : vector<128xf32> to vector<1x128xf32>
    %32 = arith.addf %25, %31 : vector<1x128xf32>
    %cst_10 = arith.constant dense<0.000000e+00> : vector<128xf32>
    %33 = vector.multi_reduction <add>, %23, %cst_10 [0] : vector<16x128xf32> to vector<128xf32>
    %34 = vector.shape_cast %33 : vector<128xf32> to vector<1x128xf32>
    %35 = arith.addf %28, %34 : vector<1x128xf32>
    %36 = arith.mulf %23, %23 : vector<16x128xf32>
    %cst_11 = arith.constant dense<0.000000e+00> : vector<128xf32>
    %37 = vector.multi_reduction <add>, %36, %cst_11 [0] : vector<16x128xf32> to vector<128xf32>
    %38 = vector.shape_cast %37 : vector<128xf32> to vector<1x128xf32>
    %39 = arith.addf %32, %38 : vector<1x128xf32>
    %c0_12 = arith.constant 0 : index
    %c0_13 = arith.constant 0 : index
    %c0_14 = arith.constant 0 : index
    %40 = vector.load %arg3[%c0_12, %c0_13, %c0_14] : memref<1x1x128xf32, #tpu.memory_space<vmem>>, vector<1x1x128xf32>
    %41 = vector.shape_cast %40 : vector<1x1x128xf32> to vector<1x128xf32>
    %42 = vector.shape_cast %35 : vector<1x128xf32> to vector<1x1x128xf32>
    tpu.vector_store %arg3[%c0_12, %c0_13, %c0_14], %42 {strides = array<i32>} : memref<1x1x128xf32, #tpu.memory_space<vmem>>, vector<1x1x128xf32>,
    %c0_15 = arith.constant 0 : index
    %c0_16 = arith.constant 0 : index
    %c0_17 = arith.constant 0 : index
    %43 = vector.load %arg4[%c0_15, %c0_16, %c0_17] : memref<1x1x128xf32, #tpu.memory_space<vmem>>, vector<1x1x128xf32>
    %44 = vector.shape_cast %43 : vector<1x1x128xf32> to vector<1x128xf32>
    %45 = vector.shape_cast %39 : vector<1x128xf32> to vector<1x1x128xf32>
    tpu.vector_store %arg4[%c0_15, %c0_16, %c0_17], %45 {strides = array<i32>} : memref<1x1x128xf32, #tpu.memory_space<vmem>>, vector<1x1x128xf32>,
    return
  }
  func.func @transform_0(%arg0: i32) -> (i32, i32, i32) {
    %c0_i32 = arith.constant 0 : i32
    %c0_i32_0 = arith.constant 0 : i32
    %c0_i32_1 = arith.constant 0 : i32
    return %arg0, %c0_i32, %c0_i32_0 : i32, i32, i32
  }
  func.func @transform_1(%arg0: i32) -> (i32, i32) {
    %c0_i32 = arith.constant 0 : i32
    %c0_i32_0 = arith.constant 0 : i32
    %c0_i32_1 = arith.constant 0 : i32
    return %c0_i32, %c0_i32_0 : i32, i32
  }
  func.func @transform_2(%arg0: i32) -> (i32, i32, i32) {
    %c0_i32 = arith.constant 0 : i32
    %c0_i32_0 = arith.constant 0 : i32
    %c0_i32_1 = arith.constant 0 : i32
    return %arg0, %c0_i32, %c0_i32_0 : i32, i32, i32
  }
  func.func @transform_3(%arg0: i32) -> (i32, i32, i32) {
    %c0_i32 = arith.constant 0 : i32
    %c0_i32_0 = arith.constant 0 : i32
    %c0_i32_1 = arith.constant 0 : i32
    return %arg0, %c0_i32, %c0_i32_0 : i32, i32, i32
  }
}

module attributes {stable_mosaic.version = 11 : i64} {
  func.func @apply_kernel(%arg0: i32, %arg1: memref<2x1x128xf32, #tpu.memory_space<vmem>>, %arg2: memref<2x1x128xf32, #tpu.memory_space<vmem>>, %arg3: memref<2x16x128xf32, #tpu.memory_space<vmem>>, %arg4: memref<128x384xbf16, #tpu.memory_space<vmem>>, %arg5: memref<1x128xf32, #tpu.memory_space<vmem>>, %arg6: memref<1x128xf32, #tpu.memory_space<vmem>>, %arg7: memref<2x16x128xf32, #tpu.memory_space<vmem>>) attributes {dimension_semantics = [#tpu.dimension_semantics<parallel>], iteration_bounds = array<i64: 2>, scalar_prefetch = 0 : i64, scratch_operands = 0 : i64, tpu.core_type = #tpu.core_type<tc>, window_params = [{pipeline_mode = #tpu.pipeline_mode<synchronous>, transform_indices = @transform_0, window_bounds = array<i64: 2, 1, 128>}, {pipeline_mode = #tpu.pipeline_mode<synchronous>, transform_indices = @transform_1, window_bounds = array<i64: 2, 1, 128>}, {transform_indices = @transform_2, window_bounds = array<i64: 2, 16, 128>}, {pipeline_mode = #tpu.pipeline_mode<synchronous>, transform_indices = @transform_3, window_bounds = array<i64: 128, 384>}, {pipeline_mode = #tpu.pipeline_mode<synchronous>, transform_indices = @transform_4, window_bounds = array<i64: 1, 128>}, {pipeline_mode = #tpu.pipeline_mode<synchronous>, transform_indices = @transform_5, window_bounds = array<i64: 1, 128>}, {transform_indices = @transform_6, window_bounds = array<i64: 2, 16, 128>}]} {
    %c0 = arith.constant 0 : index
    %c0_0 = arith.constant 0 : index
    %c0_1 = arith.constant 0 : index
    %0 = vector.load %arg1[%c0, %c0_0, %c0_1] : memref<2x1x128xf32, #tpu.memory_space<vmem>>, vector<2x1x128xf32>
    %cst = arith.constant dense<0.000000e+00> : vector<1x128xf32>
    %1 = vector.multi_reduction <add>, %0, %cst [0] : vector<2x1x128xf32> to vector<1x128xf32>
    %c0_2 = arith.constant 0 : index
    %c0_3 = arith.constant 0 : index
    %c0_4 = arith.constant 0 : index
    %2 = vector.load %arg2[%c0_2, %c0_3, %c0_4] : memref<2x1x128xf32, #tpu.memory_space<vmem>>, vector<2x1x128xf32>
    %cst_5 = arith.constant dense<0.000000e+00> : vector<1x128xf32>
    %3 = vector.multi_reduction <add>, %2, %cst_5 [0] : vector<2x1x128xf32> to vector<1x128xf32>
    %cst_6 = arith.constant 1.562500e-02 : f32
    %4 = vector.broadcast %cst_6 : f32 to vector<1x128xf32>
    %5 = arith.mulf %1, %4 : vector<1x128xf32>
    %cst_7 = arith.constant 1.562500e-02 : f32
    %6 = vector.broadcast %cst_7 : f32 to vector<1x128xf32>
    %7 = arith.mulf %3, %6 : vector<1x128xf32>
    %8 = arith.mulf %5, %5 : vector<1x128xf32>
    %9 = arith.subf %7, %8 : vector<1x128xf32>
    %cst_8 = arith.constant 0.000000e+00 : f32
    %10 = vector.broadcast %cst_8 : f32 to vector<1x128xf32>
    %11 = arith.maximumf %9, %10 : vector<1x128xf32>
    %cst_9 = arith.constant 9.99999974E-6 : f32
    %12 = vector.broadcast %cst_9 : f32 to vector<1x128xf32>
    %13 = arith.addf %11, %12 : vector<1x128xf32>
    %14 = math.rsqrt %13 : vector<1x128xf32>
    %c0_10 = arith.constant 0 : index
    %c0_11 = arith.constant 0 : index
    %15 = vector.load %arg5[%c0_10, %c0_11] : memref<1x128xf32, #tpu.memory_space<vmem>>, vector<1x128xf32>
    %16 = arith.mulf %15, %14 : vector<1x128xf32>
    %c0_12 = arith.constant 0 : index
    %c0_13 = arith.constant 0 : index
    %17 = vector.load %arg6[%c0_12, %c0_13] : memref<1x128xf32, #tpu.memory_space<vmem>>, vector<1x128xf32>
    %18 = arith.mulf %5, %16 : vector<1x128xf32>
    %19 = arith.subf %17, %18 : vector<1x128xf32>
    %c0_14 = arith.constant 0 : index
    %c0_15 = arith.constant 0 : index
    %c0_16 = arith.constant 0 : index
    %20 = vector.load %arg3[%c0_14, %c0_15, %c0_16] : memref<2x16x128xf32, #tpu.memory_space<vmem>>, vector<2x16x128xf32>
    %21 = vector.shape_cast %20 : vector<2x16x128xf32> to vector<32x128xf32>
    %22 = arith.truncf %21 : vector<32x128xf32> to vector<32x128xbf16>
    %c0_17 = arith.constant 0 : index
    %c0_18 = arith.constant 0 : index
    %23 = vector.load %arg4[%c0_17, %c0_18] : memref<128x384xbf16, #tpu.memory_space<vmem>>, vector<128x384xbf16>
    %cst_19 = arith.constant dense<0.000000e+00> : vector<32x384xf32>
    %24 = tpu.matmul %22, %23, %cst_19 {dimension_numbers = #tpu.dot_dimension_numbers<[1], [0], [0], [1], [0, 0, 1, 1], [], []>} : vector<32x128xbf16>, vector<128x384xbf16>, vector<32x384xf32> -> vector<32x384xf32>
    %25 = vector.shape_cast %24 : vector<32x384xf32> to vector<2x16x384xf32>
    %26 = vector.extract_strided_slice %25 {offsets = [0, 0, 0], sizes = [1, 16, 384], strides = [1, 1, 1]} : vector<2x16x384xf32> to vector<1x16x384xf32>
    %27 = vector.shape_cast %26 : vector<1x16x384xf32> to vector<16x384xf32>
    %28 = vector.extract_strided_slice %27 {offsets = [0, 0], sizes = [16, 128], strides = [1, 1]} : vector<16x384xf32> to vector<16x128xf32>
    %29 = vector.extract_strided_slice %27 {offsets = [0, 128], sizes = [16, 128], strides = [1, 1]} : vector<16x384xf32> to vector<16x128xf32>
    %30 = vector.extract_strided_slice %27 {offsets = [0, 256], sizes = [16, 128], strides = [1, 1]} : vector<16x384xf32> to vector<16x128xf32>
    %c1_i32 = arith.constant 1 : i32
    %31 = tpu.dynamic_rotate %28 by %c1_i32 dim 0 : vector<16x128xf32>, i32 -> vector<16x128xf32>
    %32 = arith.addf %31, %29 : vector<16x128xf32>
    %c15_i32 = arith.constant 15 : i32
    %33 = tpu.dynamic_rotate %30 by %c15_i32 dim 0 : vector<16x128xf32>, i32 -> vector<16x128xf32>
    %34 = arith.addf %32, %33 : vector<16x128xf32>
    %35 = vector.extract_strided_slice %25 {offsets = [1, 0, 0], sizes = [1, 16, 384], strides = [1, 1, 1]} : vector<2x16x384xf32> to vector<1x16x384xf32>
    %36 = vector.shape_cast %35 : vector<1x16x384xf32> to vector<16x384xf32>
    %37 = vector.extract_strided_slice %36 {offsets = [0, 0], sizes = [16, 128], strides = [1, 1]} : vector<16x384xf32> to vector<16x128xf32>
    %38 = vector.extract_strided_slice %36 {offsets = [0, 128], sizes = [16, 128], strides = [1, 1]} : vector<16x384xf32> to vector<16x128xf32>
    %39 = vector.extract_strided_slice %36 {offsets = [0, 256], sizes = [16, 128], strides = [1, 1]} : vector<16x384xf32> to vector<16x128xf32>
    %c1_i32_20 = arith.constant 1 : i32
    %40 = tpu.dynamic_rotate %37 by %c1_i32_20 dim 0 : vector<16x128xf32>, i32 -> vector<16x128xf32>
    %41 = arith.addf %40, %38 : vector<16x128xf32>
    %c15_i32_21 = arith.constant 15 : i32
    %42 = tpu.dynamic_rotate %39 by %c15_i32_21 dim 0 : vector<16x128xf32>, i32 -> vector<16x128xf32>
    %43 = arith.addf %41, %42 : vector<16x128xf32>
    %44 = vector.broadcast %16 : vector<1x128xf32> to vector<16x128xf32>
    %45 = arith.mulf %34, %44 : vector<16x128xf32>
    %46 = vector.broadcast %19 : vector<1x128xf32> to vector<16x128xf32>
    %47 = arith.addf %45, %46 : vector<16x128xf32>
    %cst_22 = arith.constant 0.000000e+00 : f32
    %48 = vector.broadcast %cst_22 : f32 to vector<16x128xf32>
    %49 = arith.cmpf ogt, %47, %48 : vector<16x128xf32>
    %cst_23 = arith.constant 0.000000e+00 : f32
    %50 = vector.broadcast %cst_23 : f32 to vector<16x128xf32>
    %51 = arith.minimumf %47, %50 : vector<16x128xf32>
    %52 = math.exp %51 : vector<16x128xf32>
    %cst_24 = arith.constant 1.000000e+00 : f32
    %53 = vector.broadcast %cst_24 : f32 to vector<16x128xf32>
    %54 = arith.subf %52, %53 : vector<16x128xf32>
    %55 = arith.select %49, %47, %54 : vector<16x128xi1>, vector<16x128xf32>
    %c0_25 = arith.constant 0 : index
    %c0_26 = arith.constant 0 : index
    %c0_27 = arith.constant 0 : index
    %56 = vector.load %arg7[%c0_25, %c0_26, %c0_27] : memref<2x16x128xf32, #tpu.memory_space<vmem>>, vector<1x16x128xf32>
    %57 = vector.shape_cast %56 : vector<1x16x128xf32> to vector<16x128xf32>
    %58 = vector.shape_cast %55 : vector<16x128xf32> to vector<1x16x128xf32>
    tpu.vector_store %arg7[%c0_25, %c0_26, %c0_27], %58 {strides = array<i32>} : memref<2x16x128xf32, #tpu.memory_space<vmem>>, vector<1x16x128xf32>,
    %59 = vector.broadcast %16 : vector<1x128xf32> to vector<16x128xf32>
    %60 = arith.mulf %43, %59 : vector<16x128xf32>
    %61 = vector.broadcast %19 : vector<1x128xf32> to vector<16x128xf32>
    %62 = arith.addf %60, %61 : vector<16x128xf32>
    %cst_28 = arith.constant 0.000000e+00 : f32
    %63 = vector.broadcast %cst_28 : f32 to vector<16x128xf32>
    %64 = arith.cmpf ogt, %62, %63 : vector<16x128xf32>
    %cst_29 = arith.constant 0.000000e+00 : f32
    %65 = vector.broadcast %cst_29 : f32 to vector<16x128xf32>
    %66 = arith.minimumf %62, %65 : vector<16x128xf32>
    %67 = math.exp %66 : vector<16x128xf32>
    %cst_30 = arith.constant 1.000000e+00 : f32
    %68 = vector.broadcast %cst_30 : f32 to vector<16x128xf32>
    %69 = arith.subf %67, %68 : vector<16x128xf32>
    %70 = arith.select %64, %62, %69 : vector<16x128xi1>, vector<16x128xf32>
    %c1 = arith.constant 1 : index
    %c0_31 = arith.constant 0 : index
    %c0_32 = arith.constant 0 : index
    %71 = vector.load %arg7[%c1, %c0_31, %c0_32] : memref<2x16x128xf32, #tpu.memory_space<vmem>>, vector<1x16x128xf32>
    %72 = vector.shape_cast %71 : vector<1x16x128xf32> to vector<16x128xf32>
    %73 = vector.shape_cast %70 : vector<16x128xf32> to vector<1x16x128xf32>
    tpu.vector_store %arg7[%c1, %c0_31, %c0_32], %73 {strides = array<i32>} : memref<2x16x128xf32, #tpu.memory_space<vmem>>, vector<1x16x128xf32>,
    return
  }
  func.func @transform_0(%arg0: i32) -> (i32, i32, i32) {
    %c0_i32 = arith.constant 0 : i32
    %c0_i32_0 = arith.constant 0 : i32
    %c0_i32_1 = arith.constant 0 : i32
    %c0_i32_2 = arith.constant 0 : i32
    return %c0_i32, %c0_i32_0, %c0_i32_1 : i32, i32, i32
  }
  func.func @transform_1(%arg0: i32) -> (i32, i32, i32) {
    %c0_i32 = arith.constant 0 : i32
    %c0_i32_0 = arith.constant 0 : i32
    %c0_i32_1 = arith.constant 0 : i32
    %c0_i32_2 = arith.constant 0 : i32
    return %c0_i32, %c0_i32_0, %c0_i32_1 : i32, i32, i32
  }
  func.func @transform_2(%arg0: i32) -> (i32, i32, i32) {
    %c0_i32 = arith.constant 0 : i32
    %c0_i32_0 = arith.constant 0 : i32
    %c0_i32_1 = arith.constant 0 : i32
    return %arg0, %c0_i32, %c0_i32_0 : i32, i32, i32
  }
  func.func @transform_3(%arg0: i32) -> (i32, i32) {
    %c0_i32 = arith.constant 0 : i32
    %c0_i32_0 = arith.constant 0 : i32
    %c0_i32_1 = arith.constant 0 : i32
    return %c0_i32, %c0_i32_0 : i32, i32
  }
  func.func @transform_4(%arg0: i32) -> (i32, i32) {
    %c0_i32 = arith.constant 0 : i32
    %c0_i32_0 = arith.constant 0 : i32
    %c0_i32_1 = arith.constant 0 : i32
    return %c0_i32, %c0_i32_0 : i32, i32
  }
  func.func @transform_5(%arg0: i32) -> (i32, i32) {
    %c0_i32 = arith.constant 0 : i32
    %c0_i32_0 = arith.constant 0 : i32
    %c0_i32_1 = arith.constant 0 : i32
    return %c0_i32, %c0_i32_0 : i32, i32
  }
  func.func @transform_6(%arg0: i32) -> (i32, i32, i32) {
    %c0_i32 = arith.constant 0 : i32
    %c0_i32_0 = arith.constant 0 : i32
    %c0_i32_1 = arith.constant 0 : i32
    return %arg0, %c0_i32, %c0_i32_0 : i32, i32, i32
  }
}

</mosaic_0001>

<bundles_post_ra>
// kernel: conv_layer_forward.2
= control target key start
LH: loop header
LB: loop body
LE: loop exit
PB: predicated region body
PF: predicated region fallthrough
CT: control target
= control target key end

     0   :  { %s723_s12 = smov 0   ;;  %s830_s0 = inlined_call_operand.vmem [shape: f32[4,16,128], index: 0, kind: input, shape index: {}]   ;;  %s831_s1 = inlined_call_operand.vmem [shape: bf16[128,384], index: 1, kind: input, shape index: {}]   ;;  %s832_s2 = inlined_call_operand.vmem [shape: f32[2,1,128], index: 2, kind: output, shape index: {0}]   ;;  %s833_s3 = inlined_call_operand.vmem [shape: f32[2,1,128], index: 3, kind: output, shape index: {1}]  }
   0x1 LB: > { %s729_s13 = sadd.s32 4294967295, %s700_s12   ;;  %p592_p0 = scmp.ge.s32.totalorder %s700_s12, 1  ;;  %s700_s12 = sphi %s723_s12, %s14_s12  }
   0x2   : > { %p142_p1 = scmp.lt.s32.totalorder %s700_s12, 3 }
   0x4   : > { %p143_p2 = pnand %p592_p0, %p142_p1 }
   0x5   : > { %s593_s16 = sshll.u32 (!%p143_p2), %s729_s13, 1  ;;  %p175_p4 = scmp.lt.s32.totalorder (!%p143_p2), %s729_s13, 1 }
   0x6   : > { %146 = sbr.rel (%p143_p2) target bundleno = 275 (0x113), region = 28  ;;  %p169_p3 = scmp.lt.s32.totalorder (!%p143_p2), %s593_s16, 3 }
   0xb   : > { %v662_v0 = vld [vmem:[%s831_s1 + $0xac] ss:$12 sps:$4 sm:$0xff]   ;;  %v664_v1 = vld [vmem:[%s831_s1 + $0xb0] ss:$12 sps:$4 sm:$0xff]   ;;  %v702_v2 = vmov 0   ;;  %s835_s16 = smov (!%p169_p3, %s593_s16), 3  ;;  %v452_v31 = vlaneseq }
   0xc   : > { %380 = vmatprep.mubr.bf16.mxu0 %v702_v2  ;;  %348 = vmatprep.subr.bf16.mxu0 %v662_v0  ;;  %v665_v3 = vld [vmem:[%s831_s1 + $0xa8] ss:$12 sps:$4 sm:$0xff]   ;;  %v668_v5 = vld [vmem:[%s831_s1 + $0x98] ss:$12 sps:$4 sm:$0xff]   ;;  %v669_v6 = vld [vmem:[%s831_s1 + $0x90] ss:$12 sps:$4 sm:$0xff]  }
   0xd   : > { %633 = vmatprep.subr.bf16.mxu1 %v664_v1  ;;  %v666_v4 = vld [vmem:[%s831_s1 + $0x94] ss:$12 sps:$4 sm:$0xff]   ;;  %349 = vmatpush1.bf16.msra.mxu0 %v665_v3  ;;  %v670_v7 = vld [vmem:[%s831_s1 + $0x7c] ss:$12 sps:$4 sm:$0xff]   ;;  %v673_v9 = vld [vmem:[%s831_s1 + $0x78] ss:$12 sps:$4 sm:$0xff]  }
   0xe   : > { %634 = vmatpush3.bf16.msra.mxu1 %v664_v1  ;;  %350 = vmatprep.subr.bf16.mxu0 %v666_v4  ;;  %v672_v8 = vld [vmem:[%s831_s1 + $0x80] ss:$12 sps:$4 sm:$0xff]   ;;  %v674_v10 = vld [vmem:[%s831_s1 + $0x64] ss:$12 sps:$4 sm:$0xff]   ;;  %v676_v11 = vld [vmem:[%s831_s1 + $0x68] ss:$12 sps:$4 sm:$0xff]  }
   0xf   : > { %635 = vmatprep.subr.bf16.mxu1 %v668_v5  ;;  %v677_v12 = vld [vmem:[%s831_s1 + $0x60] ss:$12 sps:$4 sm:$0xff]   ;;  %s622_s14 = sshll.u32 %s835_s16, 4  ;;  %v680_v14 = vld [vmem:[%s831_s1 + $0x50] ss:$12 sps:$4 sm:$0xff]   ;;  %v453_v34 = vshrl.u32 %v452_v31, 7 }
  0x10   : > { %v678_v13 = vld [vmem:[%s831_s1 + $0x4c] ss:$12 sps:$4 sm:$0xff]   ;;  %v681_v15 = vld [vmem:[%s831_s1 + $0x48] ss:$12 sps:$4 sm:$0xff]   ;;  %s173_s24 = scalar_lea.vmem %s830_s0, %s622_s14  ;;  %v685_v20 = vld [vmem:[%s831_s1 + $0x30] ss:$12 sps:$4 sm:$0xff]  }
  0x11   : > { %351 = vmatpush1.bf16.msra.mxu0 %v669_v6  ;;  %v682_v16 = vld [vmem:[%s831_s1 + $0x34] ss:$12 sps:$4 sm:$0xff]   ;;  %v684_v17 = vld [vmem:[%s831_s1 + $0x38] ss:$12 sps:$4 sm:$0xff]   ;;  %v183_v19 = vld [vmem:[%s173_s24 + $0x8] sm:$0xff]  ;;  %vm454_vm0 = vcmp.lt.s32.totalorder %v453_v34, 1 }
  0x12   : > { %636 = vmatpush3.bf16.msra.mxu1 %v668_v5  ;;  %352 = vmatprep.subr.bf16.mxu0 %v670_v7  ;;  %v182_v18 = vld [vmem:[%s173_s24] sm:$0xff]  ;;  %v686_v22 = vld [vmem:[%s831_s1 + $0x1c] ss:$12 sps:$4 sm:$0xff]   ;;  %v184_v28 = vld [vmem:[%s173_s24 + $0x10] sm:$0xff]  ;;  %vm461_vm1 = vcmp.lt.s32.totalorder %v453_v34, 7  ;;  %s837_s13 = smov (!%p175_p4, %s729_s13), 1 }
  0x13   : > { %637 = vmatprep.subr.bf16.mxu1 %v672_v8  ;;  %v186_v21 = vpack.c.bf16 %v183_v19, %v182_v18  ;;  %v688_v23 = vld [vmem:[%s831_s1 + $0x20] ss:$12 sps:$4 sm:$0xff]   ;;  %v689_v24 = vld [vmem:[%s831_s1 + $0x18] ss:$12 sps:$4 sm:$0xff]   ;;  %v692_v26 = vld [vmem:[%s831_s1 + $0x8] ss:$12 sps:$4 sm:$0xff]   ;;  %s177_s20 = scalar_lea.vmem %s832_s2, %s837_s13  ;;  %s180_s23 = scalar_lea.vmem %s833_s3, %s837_s13 }
  0x14   : > { %v690_v25 = vld [vmem:[%s831_s1 + $0x4] ss:$12 sps:$4 sm:$0xff]   ;;  %v693_v27 = vld [vmem:[%s831_s1] ss:$12 sps:$4 sm:$0xff]   ;;  %v185_v29 = vld [vmem:[%s173_s24 + $0x18] sm:$0xff] }
  0x15   : > { %353 = vmatpush1.bf16.msra.mxu0 %v673_v9  ;;  %649 = vmatprep.mubr.bf16.mxu1 %v186_v21  ;;  %v187_v30 = vpack.c.bf16 %v185_v29, %v184_v28 }
  0x16   : > { %638 = vmatpush3.bf16.msra.mxu1 %v672_v8  ;;  %354 = vmatprep.subr.bf16.mxu0 %v674_v10 }
  0x17   : > { %639 = vmatprep.subr.bf16.mxu1 %v676_v11 }
  0x19   : > { %355 = vmatpush1.bf16.msra.mxu0 %v677_v12 }
  0x1a   : > { %640 = vmatpush3.bf16.msra.mxu1 %v676_v11  ;;  %356 = vmatprep.subr.bf16.mxu0 %v678_v13 }
  0x1b   : > { %641 = vmatprep.subr.bf16.mxu1 %v680_v14 }
  0x1d   : > { %357 = vmatpush1.bf16.msra.mxu0 %v681_v15 }
  0x1e   : > { %642 = vmatpush3.bf16.msra.mxu1 %v680_v14  ;;  %358 = vmatprep.subr.bf16.mxu0 %v682_v16 }
  0x1f   : > { %643 = vmatprep.subr.bf16.mxu1 %v684_v17 }
  0x21   : > { %359 = vmatpush1.bf16.msra.mxu0 %v685_v20 }
  0x22   : > { %644 = vmatpush3.bf16.msra.mxu1 %v684_v17  ;;  %360 = vmatprep.subr.bf16.mxu0 %v686_v22 }
  0x23   : > { %645 = vmatprep.subr.bf16.mxu1 %v688_v23 }
  0x25   : > { %361 = vmatpush1.bf16.msra.mxu0 %v689_v24 }
  0x26   : > { %646 = vmatpush3.bf16.msra.mxu1 %v688_v23  ;;  %362 = vmatprep.subr.bf16.mxu0 %v690_v25 }
  0x27   : > { %647 = vmatprep.subr.bf16.mxu1 %v692_v26 }
  0x29   : > { %363 = vmatpush1.bf16.msra.mxu0 %v693_v27 }
  0x2a   : > { %648 = vmatpush3.bf16.msra.mxu1 %v692_v26 }
  0x2c   : > { %381 = vmatmul.mubr.bf16.vlgmr.msra.gmra.mxu0 %v186_v21 }
  0x2d   : > { %650 = vmatmul.mubr.bf16.vlgmr.msra.gmra.mxu1 %v187_v30  ;;  %390 = vmatprep.mubr.bf16.mxu0 %v702_v2 }
  0x34   : > { %391 = vmatmul.mubr.bf16.gmra.mxu0 %v187_v30 }
  0xec   : > { %v382_v32 = vpop.f32.mrf.mxu0 }
  0xed   : > { %v651_v33 = vpop.f32.mrf.mxu1  ;;  %v450_v39 = vrot.slane %v382_v32, 7 }
  0xee   : > { %v384_v35 = vpop.f32.mrf.mxu0  ;;  %v472_v59 = vrot.slane %v651_v33, 1 }
  0xef   : > { %v435_v36 = vpop.f32.mrf.mxu1 }
  0xf0   : > { %v386_v37 = vpop.f32.mrf.mxu0  ;;  %v459_v40 = vrot.slane %v435_v36, 1 }
  0xf1   : > { %v652_v38 = vpop.f32.mrf.mxu1  ;;  %v451_v41 = vrot.slane %v386_v37, 7 }
  0xf2   : > { %v388_v42 = vpop.f32.mrf.mxu0  ;;  %v473_v60 = vrot.slane %v652_v38, 1 }
  0xf3   : > { %v438_v43 = vpop.f32.mrf.mxu1  ;;  %v456_v44 = vsel %vm454_vm0, %v451_v41, %v450_v39  ;;  %v455_v45 = vsel %vm454_vm0, %v450_v39, %v451_v41 }
  0xf4   : > { %v460_v46 = vrot.slane %v438_v43, 1  ;;  %v457_v47 = vadd.f32 %v456_v44, %v384_v35  ;;  %v458_v48 = vadd.f32 %v455_v45, %v388_v42  ;;  %v392_v49 = vpop.f32.mrf.mxu0  ;;  %v474_v8 = vsel %vm461_vm1, %v472_v59, %v473_v60 }
  0xf5   : > { %v466_v61 = vrot.slane %v392_v49, 7  ;;  %v475_v9 = vsel %vm461_vm1, %v473_v60, %v472_v59 }
  0xf6   : > { %v462_v50 = vsel %vm461_vm1, %v459_v40, %v460_v46  ;;  %v463_v51 = vsel %vm461_vm1, %v460_v46, %v459_v40  ;;  %v394_v54 = vpop.f32.mrf.mxu0 }
  0xf7   : > { %v464_v52 = vadd.f32 %v462_v50, %v457_v47  ;;  %v465_v53 = vadd.f32 %v463_v51, %v458_v48 }
  0xf8   : > { %v396_v58 = vpop.f32.mrf.mxu0 }
  0xf9   : > { %v478_v55 = vadd.f32 %v465_v53, %v464_v52  ;;  %v486_v56 = vmul.f32 %v464_v52, %v464_v52  ;;  %v487_v57 = vmul.f32 %v465_v53, %v465_v53  ;;  %v467_v62 = vrot.slane %v396_v58, 7 }
  0xfa   : > { %v398_v1 = vpop.f32.mrf.mxu0 }
  0xfb   : > { %v479_v63 = vrot.slane %v478_v55, 4  ;;  %v488_v0 = vadd.f32 %v487_v57, %v486_v56  ;;  %v469_v2 = vsel %vm454_vm0, %v467_v62, %v466_v61  ;;  %v468_v3 = vsel %vm454_vm0, %v466_v61, %v467_v62 }
  0xfc   : > { %v470_v6 = vadd.f32 %v469_v2, %v394_v54  ;;  %v471_v7 = vadd.f32 %v468_v3, %v398_v1 }
  0xfd   : > { %v480_v4 = vadd.f32 %v479_v63, %v478_v55  ;;  %v489_v5 = vrot.slane %v488_v0, 4 }
  0xfe   : > { %v476_v10 = vadd.f32 %v474_v8, %v470_v6  ;;  %v477_v11 = vadd.f32 %v475_v9, %v471_v7 }
  0xff   : > { %v490_v12 = vadd.f32 %v489_v5, %v488_v0  ;;  %v481_v13 = vrot.slane %v480_v4, 2 }
 0x100   : > { %v496_v14 = vadd.f32 %v477_v11, %v476_v10  ;;  %v504_v15 = vmul.f32 %v476_v10, %v476_v10  ;;  %v505_v16 = vmul.f32 %v477_v11, %v477_v11 }
 0x101   : > { %v491_v18 = vrot.slane %v490_v12, 2  ;;  %v482_v20 = vadd.f32 %v481_v13, %v480_v4 }
 0x102   : > { %v497_v17 = vrot.slane %v496_v14, 4  ;;  %v506_v19 = vadd.f32 %v505_v16, %v504_v15 }
 0x103   : > { %v492_v24 = vadd.f32 %v491_v18, %v490_v12  ;;  %v483_v26 = vrot.slane %v482_v20, 1 }
 0x104   : > { %v498_v21 = vadd.f32 %v497_v17, %v496_v14  ;;  %v507_v22 = vrot.slane %v506_v19, 4 }
 0x105   : > { %v493_v30 = vrot.slane %v492_v24, 1  ;;  %v484_v32 = vadd.f32 %v483_v26, %v482_v20 }
 0x106   : > { %v499_v23 = vrot.slane %v498_v21, 2  ;;  %v508_v25 = vadd.f32 %v507_v22, %v506_v19 }
 0x107   : > { %v494_v36 = vadd.f32 %v493_v30, %v492_v24 }
 0x108   : > { %v500_v27 = vadd.f32 %v499_v23, %v498_v21  ;;  %v509_v28 = vrot.slane %v508_v25, 2 }
 0x10a   : > { %v501_v29 = vrot.slane %v500_v27, 1  ;;  %v510_v31 = vadd.f32 %v509_v28, %v508_v25 }
 0x10c   : > { %v502_v33 = vadd.f32 %v501_v29, %v500_v27  ;;  %v511_v34 = vrot.slane %v510_v31, 1 }
 0x10e   : > { %v503_v35 = vadd.f32 %v502_v33, %v484_v32  ;;  %v512_v37 = vadd.f32 %v511_v34, %v510_v31 }
 0x110   : > { %514 = vst [vmem:[%s177_s20] sm:$0x1] %v503_v35  ;;  %v513_v38 = vadd.f32 %v512_v37, %v494_v36 }
 0x112   : > { %515 = vst [vmem:[%s180_s23] sm:$0x1] %v513_v38 }
 0x113 PF: > { %s14_s12 = sadd.s32 1, %s700_s12  }
 0x114   : > { %p11_p5 = scmp.ge.s32.totalorder %s14_s12, 4  }
 0x116   :  { %13 = sbr.rel (!%p11_p5) target bundleno = 1 (0x1), region = 70 }

// kernel: conv_layer_forward.3
= control target key start
LH: loop header
LB: loop body
LE: loop exit
PB: predicated region body
PF: predicated region fallthrough
CT: control target
= control target key end

     0   :  { %11 = vsyncpa [#allocation3], 0  ;;  %s1165_s0 = inlined_call_operand.vmem [shape: f32[2,1,128], index: 0, kind: input, shape index: {}]   ;;  %s1166_s1 = inlined_call_operand.vmem [shape: f32[2,1,128], index: 1, kind: input, shape index: {}]   ;;  %s1167_s2 = inlined_call_operand.vmem [shape: f32[4,16,128], index: 2, kind: input, shape index: {}]   ;;  %s1168_s3 = inlined_call_operand.vmem [shape: bf16[128,384], index: 3, kind: input, shape index: {}]   ;;  %s1169_s4 = inlined_call_operand.vmem [shape: f32[1,128], index: 4, kind: input, shape index: {}]   ;;  %s1170_s5 = inlined_call_operand.vmem [shape: f32[1,128], index: 5, kind: input, shape index: {}]   ;;  %s1171_s6 = inlined_call_operand.hbm [shape: f32[4,16,128], index: 6, kind: output, shape index: {}]  }
   0x1   :  { %13 = vsyncpa [#allocation3 + $0x1], 0  ;;  %s964_s21 = smov 0   ;;  %s966_s22 = smov 0  }
   0x2   :  { %s968_s23 = smov 0   ;;  %s970_s24 = smov 0  }
   0x3 LB: > { %s985_s25 = sadd.s32 4294967295, %s923_s24   ;;  %s702_s26 = sadd.s32 4294967294, %s923_s24   ;;  %s923_s24 = sphi %s970_s24, %s1177_s24   ;;  %s919_s23 = sphi %s968_s23, %s1176_s23   ;;  %s915_s22 = sphi %s966_s22, %s1175_s22   ;;  %s911_s21 = sphi %s964_s21, %s1174_s21  }
   0x4   : > { %s989_s27 = sadd.s32 1, %s923_s24   ;;  %s157_s28 = sadd.s32 1, %s919_s23 }
   0x5   : > { %s154_s29 = ssub.s32 %s923_s24, %s989_s27  ;;  %p167_p0 = scmp.ne.s32.totalorder %s919_s23, %s915_s22 }
   0x6   : > { %p155_p1 = scmp.eq.s32.totalorder %s154_s29, 0  ;;  %p168_p2 = scmp.eq.s32.totalorder %s985_s25, 1 }
   0x7   : > { %p173_p3 = scmp.ne.s32.totalorder %s915_s22, %s911_s21  ;;  %p174_p4 = scmp.eq.s32.totalorder %s702_s26, 1 }
   0x8   : > { %s1000_s30 = scalar_select %p155_p1, %s919_s23, %s157_s28  }
   0x9   : > { %p1002_p5 = por %p168_p2, %p167_p0  ;;  %p1006_p6 = por %p174_p4, %p173_p3 }
   0xa   : > { %p705_p7 = scmp.ge.s32.totalorder %s923_s24, 1  ;;  %p217_p8 = scmp.lt.s32.totalorder %s923_s24, 3 }
   0xc   : > { %p218_p9 = pnand %p705_p7, %p217_p8 }
   0xd   : > { %s707_s11 = sshll.u32 (!%p218_p9), %s985_s25, 1  ;;  %s245_s16 = sand.u32 (!%p218_p9), 1, %s915_s22  }
   0xe   : > { %221 = sbr.rel (%p218_p9) target bundleno = 304 (0x130), region = 44  ;;  %p249_p10 = scmp.lt.s32.totalorder (!%p218_p9), %s707_s11, 3 }
   0xf   : > { %s706_s17 = sshll.u32 (!%p218_p9), %s245_s16, 5  ;;  %s748_s19 = sshll.u32 (!%p218_p9), %s985_s25, 9 }
  0x10   : > { %s247_s18 = scalar_lea.vmem (!%p218_p9), [#allocation2], %s706_s17  ;;  %s1125_s25 = scalar_lea.sflag (!%p218_p9), [#allocation3], %s245_s16 }
  0x11   : > { %s640_s26 = sshll.u32 (!%p218_p9), %s247_s18, 4  ;;  %s926_s9 = smov (!%p218_p9), [#allocation2]   ;;  %s1123_s26 = int_to_ptr.vmem [resolvable:$true] %s640_s26 }
  0x12   : > { %s863_s29 = scalar_lea.vmem (!%p218_p9), %s1123_s26, 512  ;;  %s867_s10 = sshll.u32 (!%p218_p9), %s926_s9, 4  ;;  %s868_s10 = int_to_ptr.vmem [resolvable:$false] %s867_s10 }
  0x13   : > { %v821_v0 = vld [vmem:[%s1168_s3 + $0xac] ss:$12 sps:$4 sm:$0xff]   ;;  %v823_v1 = vld [vmem:[%s1168_s3 + $0xb0] ss:$12 sps:$4 sm:$0xff]   ;;  %v925_v2 = vmov 0   ;;  %s1179_s11 = smov (!%p249_p10, %s707_s11), 3  ;;  %v550_v49 = vlaneseq  ;;  %p864_p11 = scmp.ne.s32.totalorder %s1123_s26, %s863_s29 }
  0x14   : > { %478 = vmatprep.mubr.bf16.mxu0 %v925_v2  ;;  %446 = vmatprep.subr.bf16.mxu0 %v821_v0  ;;  %v824_v3 = vld [vmem:[%s1168_s3 + $0xa8] ss:$12 sps:$4 sm:$0xff]   ;;  %v827_v5 = vld [vmem:[%s1168_s3 + $0x98] ss:$12 sps:$4 sm:$0xff]   ;;  %v828_v6 = vld [vmem:[%s1168_s3 + $0x90] ss:$12 sps:$4 sm:$0xff]   ;;  %p870_p0 = scmp.lt.s32.totalorder %s1123_s26, %s868_s10 }
  0x15   : > { %759 = vmatprep.subr.bf16.mxu1 %v823_v1  ;;  %v825_v4 = vld [vmem:[%s1168_s3 + $0x94] ss:$12 sps:$4 sm:$0xff]   ;;  %447 = vmatpush1.bf16.msra.mxu0 %v824_v3  ;;  %v829_v7 = vld [vmem:[%s1168_s3 + $0x7c] ss:$12 sps:$4 sm:$0xff]   ;;  %v832_v9 = vld [vmem:[%s1168_s3 + $0x78] ss:$12 sps:$4 sm:$0xff]   ;;  %p865_p12 = pnand %p864_p11, %p1002_p5 }
  0x16   : > { %760 = vmatpush3.bf16.msra.mxu1 %v823_v1  ;;  %448 = vmatprep.subr.bf16.mxu0 %v825_v4  ;;  %v831_v8 = vld [vmem:[%s1168_s3 + $0x80] ss:$12 sps:$4 sm:$0xff]   ;;  %v833_v10 = vld [vmem:[%s1168_s3 + $0x64] ss:$12 sps:$4 sm:$0xff]   ;;  %v835_v11 = vld [vmem:[%s1168_s3 + $0x68] ss:$12 sps:$4 sm:$0xff]  }
  0x17   : > { %761 = vmatprep.subr.bf16.mxu1 %v827_v5  ;;  %v836_v12 = vld [vmem:[%s1168_s3 + $0x60] ss:$12 sps:$4 sm:$0xff]   ;;  %s746_s20 = sshll.u32 %s1179_s11, 4  ;;  %v839_v14 = vld [vmem:[%s1168_s3 + $0x50] ss:$12 sps:$4 sm:$0xff]   ;;  %vm259_vm0 = vcmask 1040384   ;;  %p866_p13 = pneg %p865_p12 }
  0x18   : > { %v837_v13 = vld [vmem:[%s1168_s3 + $0x4c] ss:$12 sps:$4 sm:$0xff]   ;;  %v840_v15 = vld [vmem:[%s1168_s3 + $0x48] ss:$12 sps:$4 sm:$0xff]   ;;  %s253_s15 = scalar_lea.vmem %s1167_s2, %s746_s20  ;;  %v844_v20 = vld [vmem:[%s1168_s3 + $0x30] ss:$12 sps:$4 sm:$0xff]  }
  0x19   : > { %449 = vmatpush1.bf16.msra.mxu0 %v828_v6  ;;  %v841_v16 = vld [vmem:[%s1168_s3 + $0x34] ss:$12 sps:$4 sm:$0xff]   ;;  %v843_v17 = vld [vmem:[%s1168_s3 + $0x38] ss:$12 sps:$4 sm:$0xff]   ;;  %v281_v19 = vld [vmem:[%s253_s15 + $0x8] sm:$0xff]  ;;  %v551_v53 = vshrl.u32 %v550_v49, 7 }
  0x1a   : > { %762 = vmatpush3.bf16.msra.mxu1 %v827_v5  ;;  %450 = vmatprep.subr.bf16.mxu0 %v829_v7  ;;  %v280_v18 = vld [vmem:[%s253_s15] sm:$0xff]  ;;  %v845_v22 = vld [vmem:[%s1168_s3 + $0x1c] ss:$12 sps:$4 sm:$0xff]   ;;  %v282_v28 = vld [vmem:[%s253_s15 + $0x10] sm:$0xff]  ;;  %s869_s12 = scalar_lea.vmem %s868_s10, 1024 }
  0x1b   : > { %763 = vmatprep.subr.bf16.mxu1 %v831_v8  ;;  %v284_v21 = vpack.c.bf16 %v281_v19, %v280_v18  ;;  %v847_v23 = vld [vmem:[%s1168_s3 + $0x20] ss:$12 sps:$4 sm:$0xff]   ;;  %v848_v24 = vld [vmem:[%s1168_s3 + $0x18] ss:$12 sps:$4 sm:$0xff]   ;;  %v851_v26 = vld [vmem:[%s1168_s3 + $0x8] ss:$12 sps:$4 sm:$0xff]   ;;  %p871_p1 = scmp.lt.s32.totalorder %s869_s12, %s863_s29 }
  0x1c   : > { %v849_v25 = vld [vmem:[%s1168_s3 + $0x4] ss:$12 sps:$4 sm:$0xff]   ;;  %v852_v27 = vld [vmem:[%s1168_s3] ss:$12 sps:$4 sm:$0xff]   ;;  %v283_v29 = vld [vmem:[%s253_s15 + $0x18] sm:$0xff]  ;;  %vm552_vm1 = vcmp.lt.s32.totalorder %v551_v53, 1  ;;  %s1121_s15 = scalar_lea.hbm %s1171_s6, %s748_s19 }
  0x1d   : > { %451 = vmatpush1.bf16.msra.mxu0 %v832_v9  ;;  %775 = vmatprep.mubr.bf16.mxu1 %v284_v21  ;;  %v285_v30 = vpack.c.bf16 %v283_v29, %v282_v28  ;;  %v257_v31 = vld [vmem:[%s1165_s0] sm:$0x1]  ;;  %v258_v32 = vld [vmem:[%s1165_s0 + $0x1] sm:$0x1]  ;;  %v579_v60 = vsub.s32 0, %v551_v53  ;;  %vm559_vm2 = vcmp.lt.s32.totalorder %v551_v53, 7  ;;  %p872_p2 = por %p871_p1, %p870_p0 }
  0x1e   : > { %764 = vmatpush3.bf16.msra.mxu1 %v831_v8  ;;  %452 = vmatprep.subr.bf16.mxu0 %v833_v10  ;;  %v260_v33 = vsel %vm259_vm0, %v257_v31, 0.0  ;;  %v261_v34 = vsel %vm259_vm0, %v258_v32, 0.0  ;;  %v263_v35 = vld [vmem:[%s1166_s1] sm:$0x1]  ;;  %v264_v36 = vld [vmem:[%s1166_s1 + $0x1] sm:$0x1] }
  0x1f   : > { %765 = vmatprep.subr.bf16.mxu1 %v835_v11  ;;  %v262_v37 = vadd.f32 %v261_v34, %v260_v33  ;;  %v265_v38 = vsel %vm259_vm0, %v263_v35, 0.0  ;;  %v266_v39 = vsel %vm259_vm0, %v264_v36, 0.0  ;;  %v275_v48 = vld [vmem:[%s1169_s4] sm:$0x1]  ;;  %p873_p3 = pnand %p872_p2, %p866_p13 }
  0x20   : > { %v267_v40 = vadd.f32 %v266_v39, %v265_v38  ;;  %v277_v57 = vld [vmem:[%s1170_s5] sm:$0x1] }
  0x21   : > { %453 = vmatpush1.bf16.msra.mxu0 %v836_v12  ;;  %v268_v41 = vmul.f32 0.015625, %v262_v37 }
  0x22   : > { %766 = vmatpush3.bf16.msra.mxu1 %v835_v11  ;;  %454 = vmatprep.subr.bf16.mxu0 %v837_v13  ;;  %v269_v42 = vmul.f32 0.015625, %v267_v40 }
  0x23   : > { %767 = vmatprep.subr.bf16.mxu1 %v839_v14  ;;  %v270_v43 = vmul.f32 %v268_v41, %v268_v41 }
  0x25   : > { %455 = vmatpush1.bf16.msra.mxu0 %v840_v15  ;;  %v271_v44 = vsub.f32 %v269_v42, %v270_v43 }
  0x26   : > { %768 = vmatpush3.bf16.msra.mxu1 %v839_v14  ;;  %456 = vmatprep.subr.bf16.mxu0 %v841_v16 }
  0x27   : > { %769 = vmatprep.subr.bf16.mxu1 %v843_v17  ;;  %v272_v45 = vmax.f32 %v271_v44, 0.0 }
  0x29   : > { %457 = vmatpush1.bf16.msra.mxu0 %v844_v20  ;;  %v273_v46 = vadd.f32 1e-05, %v272_v45 }
  0x2a   : > { %770 = vmatpush3.bf16.msra.mxu1 %v843_v17  ;;  %458 = vmatprep.subr.bf16.mxu0 %v845_v22 }
  0x2b   : > { %771 = vmatprep.subr.bf16.mxu1 %v847_v23  ;;  %853 = vrsqrt.f32 %v273_v46 }
  0x2d   : > { %459 = vmatpush1.bf16.msra.mxu0 %v848_v24 }
  0x2e   : > { %772 = vmatpush3.bf16.msra.mxu1 %v847_v23  ;;  %460 = vmatprep.subr.bf16.mxu0 %v849_v25 }
  0x2f   : > { %773 = vmatprep.subr.bf16.mxu1 %v851_v26 }
  0x31   : > { %461 = vmatpush1.bf16.msra.mxu0 %v852_v27 }
  0x32   : > { %774 = vmatpush3.bf16.msra.mxu1 %v851_v26 }
  0x34   : > { %479 = vmatmul.mubr.bf16.vlgmr.msra.gmra.mxu0 %v284_v21 }
  0x35   : > { %776 = vmatmul.mubr.bf16.vlgmr.msra.gmra.mxu1 %v285_v30  ;;  %488 = vmatprep.mubr.bf16.mxu0 %v925_v2 }
  0x38   : > { %v854_v47 = vpop.eup %853 }
  0x39   : > { %v276_v50 = vmul.f32 %v854_v47, %v275_v48 }
  0x3b   : > { %v278_v56 = vmul.f32 %v276_v50, %v268_v41  ;;  %v580_v8 = vrot.slane %v276_v50, %v579_v60 }
  0x3c   : > { %489 = vmatmul.mubr.bf16.gmra.mxu0 %v285_v30 }
  0x3d   : > { %v279_v1 = vsub.f32 %v277_v57, %v278_v56 }
  0x3f   : > { %v588_v14 = vrot.slane %v279_v1, %v579_v60 }
  0xf4   : > { %v480_v51 = vpop.f32.mrf.mxu0 }
  0xf5   : > { %v777_v52 = vpop.f32.mrf.mxu1  ;;  %v548_v61 = vrot.slane %v480_v51, 7 }
  0xf6   : > { %v482_v54 = vpop.f32.mrf.mxu0  ;;  %v570_v21 = vrot.slane %v777_v52, 1 }
  0xf7   : > { %v533_v55 = vpop.f32.mrf.mxu1 }
  0xf8   : > { %v484_v58 = vpop.f32.mrf.mxu0  ;;  %v557_v62 = vrot.slane %v533_v55, 1 }
  0xf9   : > { %v778_v59 = vpop.f32.mrf.mxu1  ;;  %v549_v63 = vrot.slane %v484_v58, 7 }
  0xfa   : > { %v486_v0 = vpop.f32.mrf.mxu0  ;;  %v571_v22 = vrot.slane %v778_v59, 1 }
  0xfb   : > { %v536_v2 = vpop.f32.mrf.mxu1  ;;  %v554_v3 = vsel %vm552_vm1, %v549_v63, %v548_v61  ;;  %v553_v4 = vsel %vm552_vm1, %v548_v61, %v549_v63 }
  0xfc   : > { %v558_v5 = vrot.slane %v536_v2, 1  ;;  %v555_v6 = vadd.f32 %v554_v3, %v482_v54  ;;  %v556_v7 = vadd.f32 %v553_v4, %v486_v0  ;;  %v490_v9 = vpop.f32.mrf.mxu0  ;;  %v572_v32 = vsel %vm559_vm2, %v570_v21, %v571_v22 }
  0xfd   : > { %v564_v19 = vrot.slane %v490_v9, 7  ;;  %v573_v35 = vsel %vm559_vm2, %v571_v22, %v570_v21 }
  0xfe   : > { %v560_v10 = vsel %vm559_vm2, %v557_v62, %v558_v5  ;;  %v561_v11 = vsel %vm559_vm2, %v558_v5, %v557_v62  ;;  %v492_v15 = vpop.f32.mrf.mxu0 }
  0xff   : > { %v562_v12 = vadd.f32 %v560_v10, %v555_v6  ;;  %v563_v13 = vadd.f32 %v561_v11, %v556_v7 }
 0x100   : > { %v494_v18 = vpop.f32.mrf.mxu0 }
 0x101   : > { %v582_v16 = vmul.f32 %v580_v8, %v562_v12  ;;  %v583_v17 = vmul.f32 %v580_v8, %v563_v13  ;;  %v565_v20 = vrot.slane %v494_v18, 7 }
 0x102   : > { %v496_v25 = vpop.f32.mrf.mxu0 }
 0x103   : > { %v590_v23 = vadd.f32 %v588_v14, %v582_v16  ;;  %v591_v24 = vadd.f32 %v588_v14, %v583_v17  ;;  %v567_v26 = vsel %vm552_vm1, %v565_v20, %v564_v19  ;;  %v566_v27 = vsel %vm552_vm1, %v564_v19, %v565_v20 }
 0x104   : > { %v568_v30 = vadd.f32 %v567_v26, %v492_v15  ;;  %v569_v31 = vadd.f32 %v566_v27, %v496_v25 }
 0x105   : > { %v594_v28 = vmin.f32 %v590_v23, 0.0  ;;  %v595_v29 = vmin.f32 %v591_v24, 0.0  ;;  %vm592_vm3 = vcmp.gt.f32.partialorder %v590_v23, 0.0  ;;  %vm593_vm4 = vcmp.gt.f32.partialorder %v591_v24, 0.0 }
 0x106   : > { %v574_v36 = vadd.f32 %v572_v32, %v568_v30  ;;  %v575_v37 = vadd.f32 %v573_v35, %v569_v31 }
 0x107   : > { %v596_v33 = vmul.f32 1.442695, %v594_v28  ;;  %v598_v34 = vmul.f32 1.442695, %v595_v29 }
 0x108   : > { %v606_v38 = vmul.f32 %v580_v8, %v574_v36  ;;  %v607_v39 = vmul.f32 %v580_v8, %v575_v37 }
 0x109   : > { %855 = vpow2.f32 %v596_v33 }
 0x10a   : > { %857 = vpow2.f32 %v598_v34  ;;  %v608_v40 = vadd.f32 %v606_v38, %v588_v14  ;;  %v609_v41 = vadd.f32 %v607_v39, %v588_v14 }
 0x10c   : > { %v612_v42 = vmin.f32 %v608_v40, 0.0  ;;  %v613_v43 = vmin.f32 %v609_v41, 0.0  ;;  %vm610_vm5 = vcmp.gt.f32.partialorder %v608_v40, 0.0  ;;  %vm611_vm6 = vcmp.gt.f32.partialorder %v609_v41, 0.0 }
 0x10e   : > { %v614_v44 = vmul.f32 1.442695, %v612_v42  ;;  %v616_v45 = vmul.f32 1.442695, %v613_v43 }
 0x110   : > { %859 = vpow2.f32 %v614_v44 }
 0x111   : > { %861 = vpow2.f32 %v616_v45 }
 0x116   : > { %v856_v46 = vpop.eup %855 }
 0x117   : > { %v858_v47 = vpop.eup %857  ;;  %v734_v48 = vadd.f32 -1.0, %v856_v46 }
 0x118   : > { %v735_v49 = vadd.f32 -1.0, %v858_v47 }
 0x119   : > { %v602_v50 = vsel %vm592_vm3, %v590_v23, %v734_v48 }
 0x11a   : > { %v603_v51 = vsel %vm593_vm4, %v591_v24, %v735_v49  ;;  %604 = vst [vmem:[%s247_s18] sm:$0xff] %v602_v50 }
 0x11b   : > { %605 = vst [vmem:[%s247_s18 + $0x8] sm:$0xff] %v603_v51 }
 0x11d   : > { %v860_v52 = vpop.eup %859 }
 0x11e   : > { %v862_v53 = vpop.eup %861  ;;  %v736_v54 = vadd.f32 -1.0, %v860_v52 }
 0x11f   : > { %v737_v55 = vadd.f32 -1.0, %v862_v53 }
 0x120   : > { %v620_v56 = vsel %vm610_vm5, %v608_v40, %v736_v54 }
 0x121   : > { %738 = vst [vmem:[%s247_s18 + $0x10] sm:$0xff] %v620_v56  ;;  %v621_v57 = vsel %vm611_vm6, %v609_v41, %v737_v55 }
 0x122   : > { %739 = vst [vmem:[%s247_s18 + $0x18] sm:$0xff] %v621_v57 }
 0x123   : > { %876 = shalt.err (!%p873_p3)
}
 0x124   : > { %s877_s13 = scalar_lea.hbm %s1121_s15, 512  ;;  %s881_s16 = scalar_lea.hbm %s1171_s6, 1024 }
 0x125   : > { %p878_p4 = scmp.ne.s32.totalorder %s1121_s15, %s877_s13  ;;  %p882_p9 = scmp.lt.s32.totalorder %s1121_s15, %s1171_s6 }
 0x126   : > { %p883_p10 = scmp.lt.s32.totalorder %s881_s16, %s877_s13 }
 0x127   : > { %p879_p7 = pnand %p878_p4, %p1002_p5 }
 0x128   : > { %p884_p11 = por %p883_p10, %p882_p9 }
 0x129   : > { %p880_p8 = pneg %p879_p7 }
 0x12b   : > { %p885_p12 = pnand %p884_p11, %p880_p8 }
 0x12d   : > { %888 = shalt.err (!%p885_p12)
}
 0x12e   : > { %s927_s19 = smov 128   ;;  %s928_s20 = smov 8  }
 0x12f   : > { %779 = dma.vmem_to_hbm [thread:$0]  (%p1002_p5), %s1123_s26, 512, %s1121_s15, %s1125_s25, %s927_s19, %s927_s19, %s928_s20  }
 0x130 PF: > { %p785_p13 = scmp.ge.s32.totalorder %s923_s24, 2  ;;  %s655_s28 = sand.u32 1, %s911_s21  }
 0x131   : > { %s656_s29 = scalar_lea.sflag [#allocation3], %s655_s28 }
 0x132   : > { %p782_p0 = pnand %p785_p13, %p1006_p6 }
 0x134   : > { %p783_p1 = pneg %p782_p0 }
 0x136   : > { %906 = dma.done.wait (%p783_p1), %s656_s29, 512  }
 0x137   : > { %908 = vsyncadd (%p783_p1), %s656_s29, 4294966784  ;;  %p16_p2 = scmp.ge.s32.totalorder %s989_s27, 4   ;;  %s1174_s21 = smov %s915_s22 }
 0x138   : > { %s1175_s22 = smov %s919_s23  ;;  %s1176_s23 = smov %s1000_s30 }
 0x139   : > { %s1177_s24 = smov %s989_s27  ;;  %18 = sbr.rel (!%p16_p2) target bundleno = 3 (0x3), region = 80 }
 0x13e   :  { %661 = vsyncpa [#allocation3], 1 }
 0x13f   :  { %663 = vsyncpa [#allocation3 + $0x1], 1 }

</bundles_post_ra>
